<compile_context>
chip_gen: v7x
topology: tpu7x:2x2x1
jax: 0.10.0
libtpu: 0.0.40
codegen_flags: <defaults>
</compile_context>

<pallas_src>
import jax
import jax.numpy as jnp
from jax.experimental import pallas as pl
from jax.experimental.pallas import tpu as pltpu


def _round_up(x: int, m: int) -> int:
    return ((x + m - 1) // m) * m


def _cdiv(a: int, b: int) -> int:
    return -(-a // b)


def _plan_batch(B: int, tile_b: int):
    """Pick a batch tile that minimizes padding; >=2 tiles when B is large
    enough so both v7x TensorCores get work (no-op cost on v5e/v6e)."""
    if B <= 32:
        # Single tile equal to the full batch dim -> no padding, any B allowed.
        return B, B, 1
    n_tiles = max(2, _cdiv(B, tile_b))
    tb = min(_round_up(_cdiv(B, n_tiles), 16), _round_up(B, 16))
    b_pad = _round_up(B, tb)
    return tb, b_pad, b_pad // tb


def _nli_cls_kernel(x1_ref, x2_ref, w1_ref, b1_ref, w2_ref, b2_ref, out_ref):
    x1_bf = x1_ref[...]                          # [TB, d] bf16
    x2_bf = x2_ref[...]                          # [TB, d] bf16

    # Elementwise features in f32 (v5e has no bf16 VPU; fine everywhere).
    x1 = x1_bf.astype(jnp.float32)
    x2 = x2_bf.astype(jnp.float32)
    diff = jnp.abs(x1 - x2).astype(jnp.bfloat16)
    prod = (x1 * x2).astype(jnp.bfloat16)

    # Build the [TB, 4*d] concat in-register and do ONE MXU push (K = 4*d).
    feat = jnp.concatenate([x1_bf, x2_bf, diff, prod], axis=1)

    # Layer 1: bf16 operands, f32 accumulation; bias + activation in f32.
    h = jnp.dot(feat, w1_ref[...], preferred_element_type=jnp.float32)
    h = h + b1_ref[...]                          # [1, hid_pad] broadcast
    h = jnp.maximum(h, 0.01 * h)                 # LeakyReLU(0.01)

    # Layer 2: narrow classifier head (num_cls lanes only -> small writeback).
    out = jnp.dot(h.astype(jnp.bfloat16), w2_ref[...],
                  preferred_element_type=jnp.float32)
    out_ref[...] = (out + b2_ref[...]).astype(out_ref.dtype)


def prepare_params(w1, b1, w2, b2):
    """One-time param prep (bf16 cast + hid padded to 128). Hoisted out of the
    forward path so weights are not re-streamed per call."""
    hid = w1.shape[1]
    num_cls = w2.shape[1]
    hid_pad = _round_up(hid, 128)
    w1_bf = jnp.pad(w1, ((0, 0), (0, hid_pad - hid))).astype(jnp.bfloat16)
    b1_p = jnp.pad(b1, (0, hid_pad - hid)).reshape(1, hid_pad).astype(jnp.float32)
    w2_bf = jnp.pad(w2, ((0, hid_pad - hid), (0, 0))).astype(jnp.bfloat16)
    b2_p = b2.reshape(1, num_cls).astype(jnp.float32)
    return w1_bf, b1_p, w2_bf, b2_p


def nli_cls_forward(x1, x2, params, *, tile_b=1024):
    """x1, x2: [B, in_dim]; params = prepare_params(w1, b1, w2, b2).
    Returns [B, num_cls] f32."""
    w1_bf, b1_p, w2_bf, b2_p = params
    B, d = x1.shape
    hid_pad = w1_bf.shape[1]
    num_cls = w2_bf.shape[1]

    # Activations streamed as bf16 (halves input HBM traffic).
    x1 = x1.astype(jnp.bfloat16)
    x2 = x2.astype(jnp.bfloat16)

    tb, b_pad, n_tiles = _plan_batch(B, tile_b)
    if b_pad != B:
        x1 = jnp.pad(x1, ((0, b_pad - B), (0, 0)))
        x2 = jnp.pad(x2, ((0, b_pad - B), (0, 0)))

    # VMEM budget: double-buffered activations/output, single-buffered weights,
    # plus rough in-kernel intermediates; 2x headroom, capped at v7x's 64 MiB.
    vmem_bytes = (
        2 * (2 * tb * d * 2)                 # x1, x2 bf16, double-buffered
        + 4 * d * hid_pad * 2                # W1 bf16 (single-buffered)
        + hid_pad * 4                        # b1 f32
        + hid_pad * num_cls * 2              # W2 bf16
        + num_cls * 4                        # b2 f32
        + 2 * tb * num_cls * 4               # output f32, double-buffered
        + tb * (4 * d * 2 + 2 * hid_pad * 4)  # feat + h intermediates
    )
    vmem_limit = int(min(64 << 20, max(32 << 20, 2 * vmem_bytes)))

    cost = pl.CostEstimate(
        flops=int(2 * B * (4 * d * hid_pad + hid_pad * num_cls)),
        transcendentals=0,
        bytes_accessed=int(
            2 * B * d * 2                    # x1 + x2 bf16
            + 4 * d * hid_pad * 2 + hid_pad * 4
            + hid_pad * num_cls * 2 + num_cls * 4
            + B * num_cls * 4                # output
        ),
    )

    resident = dict(pipeline_mode=pl.Buffered(1))   # constant blocks: no double-buffer
    out = pl.pallas_call(
        _nli_cls_kernel,
        out_shape=jax.ShapeDtypeStruct((b_pad, num_cls), jnp.float32),
        grid=(n_tiles,),
        in_specs=[
            pl.BlockSpec((tb, d), lambda i: (i, 0)),                    # x1
            pl.BlockSpec((tb, d), lambda i: (i, 0)),                    # x2
            pl.BlockSpec((4 * d, hid_pad), lambda i: (0, 0), **resident),  # W1
            pl.BlockSpec((1, hid_pad), lambda i: (0, 0), **resident),      # b1
            pl.BlockSpec((hid_pad, num_cls), lambda i: (0, 0), **resident),  # W2
            pl.BlockSpec((1, num_cls), lambda i: (0, 0), **resident),       # b2
        ],
        out_specs=pl.BlockSpec((tb, num_cls), lambda i: (i, 0)),
        compiler_params=pltpu.CompilerParams(
            dimension_semantics=("parallel",),
            vmem_limit_bytes=vmem_limit),
        cost_estimate=cost,
    )(x1, x2, w1_bf, b1_p, w2_bf, b2_p)

    return out[:B] if b_pad != B else out


def _reference(x1, x2, w1, b1, w2, b2):
    x = jnp.concatenate([x1, x2, jnp.abs(x1 - x2), x1 * x2], axis=1)
    h = x @ w1 + b1
    h = jnp.where(h > 0, h, 0.01 * h)
    return h @ w2 + b2


if __name__ == "__main__":
    key = jax.random.PRNGKey(0)
    B, in_dim, hid_dim, num_cls = 8, 32, 64, 8

    k1, k2, kw1, kb1, kw2, kb2 = jax.random.split(key, 6)
    x1 = jax.random.normal(k1, (B, in_dim), dtype=jnp.float32)
    x2 = jax.random.normal(k2, (B, in_dim), dtype=jnp.float32)

    # Deterministic synthetic parameters (shapes per nn.Linear in __init__).
    w1 = jax.random.normal(kw1, (4 * in_dim, hid_dim), dtype=jnp.float32) * 0.05
    b1 = jax.random.normal(kb1, (hid_dim,), dtype=jnp.float32) * 0.05
    w2 = jax.random.normal(kw2, (hid_dim, num_cls), dtype=jnp.float32) * 0.05
    b2 = jax.random.normal(kb2, (num_cls,), dtype=jnp.float32) * 0.05

    params = prepare_params(w1, b1, w2, b2)   # one-time weight prep
    out = nli_cls_forward(x1, x2, params)
    out = jax.block_until_ready(out)

    ref = _reference(x1, x2, w1, b1, w2, b2)
    assert out.shape == (B, num_cls)
    # Tolerance accounts for bf16 matmul operands / bf16 activation streaming
    # (f32 accumulation kept throughout).
    assert jnp.allclose(out, ref, atol=2e-2, rtol=2e-2), "mismatch vs reference"

    print("KERNEL_OK")
</pallas_src>

<mosaic_0001>
module attributes {stable_mosaic.version = 11 : i64} {
  func.func @_nli_cls_kernel(%arg0: i32, %arg1: memref<8x32xbf16, #tpu.memory_space<vmem>>, %arg2: memref<8x32xbf16, #tpu.memory_space<vmem>>, %arg3: memref<128x128xbf16, #tpu.memory_space<vmem>>, %arg4: memref<1x128xf32, #tpu.memory_space<vmem>>, %arg5: memref<128x8xbf16, #tpu.memory_space<vmem>>, %arg6: memref<1x8xf32, #tpu.memory_space<vmem>>, %arg7: memref<8x8xf32, #tpu.memory_space<vmem>>) attributes {dimension_semantics = [#tpu.dimension_semantics<parallel>], iteration_bounds = array<i64: 1>, scalar_prefetch = 0 : i64, scratch_operands = 0 : i64, tpu.core_type = #tpu.core_type<tc>, window_params = [{transform_indices = @transform_0, window_bounds = array<i64: 8, 32>}, {transform_indices = @transform_1, window_bounds = array<i64: 8, 32>}, {pipeline_mode = #tpu.pipeline_mode<synchronous>, transform_indices = @transform_2, window_bounds = array<i64: 128, 128>}, {pipeline_mode = #tpu.pipeline_mode<synchronous>, transform_indices = @transform_3, window_bounds = array<i64: 1, 128>}, {pipeline_mode = #tpu.pipeline_mode<synchronous>, transform_indices = @transform_4, window_bounds = array<i64: 128, 8>}, {pipeline_mode = #tpu.pipeline_mode<synchronous>, transform_indices = @transform_5, window_bounds = array<i64: 1, 8>}, {transform_indices = @transform_6, window_bounds = array<i64: 8, 8>}]} {
    %c0 = arith.constant 0 : index
    %c0_0 = arith.constant 0 : index
    %0 = vector.load %arg1[%c0, %c0_0] : memref<8x32xbf16, #tpu.memory_space<vmem>>, vector<8x32xbf16>
    %c0_1 = arith.constant 0 : index
    %c0_2 = arith.constant 0 : index
    %1 = vector.load %arg2[%c0_1, %c0_2] : memref<8x32xbf16, #tpu.memory_space<vmem>>, vector<8x32xbf16>
    %2 = arith.extf %0 : vector<8x32xbf16> to vector<8x32xf32>
    %3 = arith.extf %1 : vector<8x32xbf16> to vector<8x32xf32>
    %4 = arith.subf %2, %3 : vector<8x32xf32>
    %5 = math.absf %4 : vector<8x32xf32>
    %6 = arith.truncf %5 : vector<8x32xf32> to vector<8x32xbf16>
    %7 = arith.mulf %2, %3 : vector<8x32xf32>
    %8 = arith.truncf %7 : vector<8x32xf32> to vector<8x32xbf16>
    %9 = tpu.concatenate %0, %1, %6, %8 in 1 : vector<8x32xbf16>, vector<8x32xbf16>, vector<8x32xbf16>, vector<8x32xbf16> -> vector<8x128xbf16>
    %c0_3 = arith.constant 0 : index
    %c0_4 = arith.constant 0 : index
    %10 = vector.load %arg3[%c0_3, %c0_4] : memref<128x128xbf16, #tpu.memory_space<vmem>>, vector<128x128xbf16>
    %cst = arith.constant dense<0.000000e+00> : vector<8x128xf32>
    %11 = tpu.matmul %9, %10, %cst {dimension_numbers = #tpu.dot_dimension_numbers<[1], [0], [0], [1], [0, 0, 1, 1], [], []>} : vector<8x128xbf16>, vector<128x128xbf16>, vector<8x128xf32> -> vector<8x128xf32>
    %c0_5 = arith.constant 0 : index
    %c0_6 = arith.constant 0 : index
    %12 = vector.load %arg4[%c0_5, %c0_6] : memref<1x128xf32, #tpu.memory_space<vmem>>, vector<1x128xf32>
    %13 = vector.broadcast %12 : vector<1x128xf32> to vector<8x128xf32>
    %14 = arith.addf %11, %13 : vector<8x128xf32>
    %cst_7 = arith.constant 0.00999999977 : f32
    %15 = vector.broadcast %cst_7 : f32 to vector<8x128xf32>
    %16 = arith.mulf %15, %14 : vector<8x128xf32>
    %17 = arith.maximumf %14, %16 : vector<8x128xf32>
    %18 = arith.truncf %17 : vector<8x128xf32> to vector<8x128xbf16>
    %c0_8 = arith.constant 0 : index
    %c0_9 = arith.constant 0 : index
    %19 = vector.load %arg5[%c0_8, %c0_9] : memref<128x8xbf16, #tpu.memory_space<vmem>>, vector<128x8xbf16>
    %cst_10 = arith.constant dense<0.000000e+00> : vector<8x8xf32>
    %20 = tpu.matmul %18, %19, %cst_10 {dimension_numbers = #tpu.dot_dimension_numbers<[1], [0], [0], [1], [0, 0, 1, 1], [], []>} : vector<8x128xbf16>, vector<128x8xbf16>, vector<8x8xf32> -> vector<8x8xf32>
    %c0_11 = arith.constant 0 : index
    %c0_12 = arith.constant 0 : index
    %21 = vector.load %arg6[%c0_11, %c0_12] : memref<1x8xf32, #tpu.memory_space<vmem>>, vector<1x8xf32>
    %22 = vector.broadcast %21 : vector<1x8xf32> to vector<8x8xf32>
    %23 = arith.addf %20, %22 : vector<8x8xf32>
    %c0_13 = arith.constant 0 : index
    %c0_14 = arith.constant 0 : index
    %24 = vector.load %arg7[%c0_13, %c0_14] : memref<8x8xf32, #tpu.memory_space<vmem>>, vector<8x8xf32>
    tpu.vector_store %arg7[%c0_13, %c0_14], %23 {strides = array<i32>} : memref<8x8xf32, #tpu.memory_space<vmem>>, vector<8x8xf32>,
    return
  }
  func.func @transform_0(%arg0: i32) -> (i32, i32) {
    %c0_i32 = arith.constant 0 : i32
    %c0_i32_0 = arith.constant 0 : i32
    return %arg0, %c0_i32 : i32, i32
  }
  func.func @transform_1(%arg0: i32) -> (i32, i32) {
    %c0_i32 = arith.constant 0 : i32
    %c0_i32_0 = arith.constant 0 : i32
    return %arg0, %c0_i32 : i32, i32
  }
  func.func @transform_2(%arg0: i32) -> (i32, i32) {
    %c0_i32 = arith.constant 0 : i32
    %c0_i32_0 = arith.constant 0 : i32
    %c0_i32_1 = arith.constant 0 : i32
    return %c0_i32, %c0_i32_0 : i32, i32
  }
  func.func @transform_3(%arg0: i32) -> (i32, i32) {
    %c0_i32 = arith.constant 0 : i32
    %c0_i32_0 = arith.constant 0 : i32
    %c0_i32_1 = arith.constant 0 : i32
    return %c0_i32, %c0_i32_0 : i32, i32
  }
  func.func @transform_4(%arg0: i32) -> (i32, i32) {
    %c0_i32 = arith.constant 0 : i32
    %c0_i32_0 = arith.constant 0 : i32
    %c0_i32_1 = arith.constant 0 : i32
    return %c0_i32, %c0_i32_0 : i32, i32
  }
  func.func @transform_5(%arg0: i32) -> (i32, i32) {
    %c0_i32 = arith.constant 0 : i32
    %c0_i32_0 = arith.constant 0 : i32
    %c0_i32_1 = arith.constant 0 : i32
    return %c0_i32, %c0_i32_0 : i32, i32
  }
  func.func @transform_6(%arg0: i32) -> (i32, i32) {
    %c0_i32 = arith.constant 0 : i32
    %c0_i32_0 = arith.constant 0 : i32
    return %arg0, %c0_i32 : i32, i32
  }
}

</mosaic_0001>

<bundles_post_ra>
// kernel: tpu_custom_call.1
= control target key start
LH: loop header
LB: loop body
LE: loop exit
PB: predicated region body
PF: predicated region fallthrough
CT: control target
= control target key end

     0   :  { %v421_v5 = vmov 0.0   ;;  %s422_s27 = smov 32   ;;  %vm423_vm0 = vmmov 0   ;;  %s424_s28 = smov 96   ;;  %s556_s0 = inlined_call_operand.vmem [shape: bf16[8,32], index: 0, kind: input, shape index: {}]   ;;  %s557_s1 = inlined_call_operand.vmem [shape: bf16[8,32], index: 1, kind: input, shape index: {}]   ;;  %s558_s2 = inlined_call_operand.vmem [shape: bf16[128,128], index: 2, kind: input, shape index: {}]   ;;  %s559_s3 = inlined_call_operand.vmem [shape: f32[1,128], index: 3, kind: input, shape index: {}]   ;;  %s560_s4 = inlined_call_operand.vmem [shape: bf16[128,8], index: 4, kind: input, shape index: {}]   ;;  %s561_s5 = inlined_call_operand.vmem [shape: f32[1,8], index: 5, kind: input, shape index: {}]   ;;  %s562_s6 = inlined_call_operand.hbm [shape: f32[8,8], index: 6, kind: output, shape index: {}]  }
   0x1   :  { %v26_v0 = vld [vmem:[%s557_s1] sm:$0xf]  ;;  %334 = vmatprep.subr.bf16.mxu0 %v421_v5  ;;  %354 = vmatprep.subr.bf16.mxu1 %v421_v5  ;;  %v382_v9 = vld [vmem:[%s558_s2 + $0x8] sm:$0xff]   ;;  %v383_v13 = vld [vmem:[%s558_s2 + $0x10] sm:$0xff]   ;;  %s425_s7 = smov 64  }
   0x2   :  { %v468_v1 = vld [vmem:[%s556_s0] sm:$0xf]  ;;  %v297_v2 = vcombine.low %v26_v0, %v26_v0  ;;  %v28_v3 = vunpack.c.l.bf16 %v26_v0  ;;  %350 = vmatprep.mubr.msk.bf16.mxu0 %vm423_vm0, %v421_v5  ;;  %370 = vmatprep.mubr.msk.bf16.mxu1 %vm423_vm0, %v421_v5  ;;  %v384_v15 = vld [vmem:[%s558_s2 + $0x18] sm:$0xff]   ;;  %v390_v16 = vld [vmem:[%s560_s4 + $0x8] sm:$0xff]  }
   0x3   :  { %v27_v4 = vunpack.c.l.bf16 %v468_v1  ;;  %v381_v6 = vld [vmem:[%s558_s2] sm:$0xff]   ;;  %v391_v18 = vld [vmem:[%s560_s4 + $0x10] sm:$0xff]  }
   0x4   :  { %37 = vrot.lane.b32.xlu0 %v297_v2, %s422_s27  ;;  %335 = vmatpush3.bf16.msra.mxu0 %v381_v6  ;;  %v389_v14 = vld [vmem:[%s560_s4] sm:$0xff]  }
   0x5   :  { %v29_v7 = vsub.f32 %v27_v4, %v28_v3  ;;  %v32_v8 = vmul.f32 %v28_v3, %v27_v4  ;;  %336 = vmatprep.subr.bf16.mxu0 %v421_v5  ;;  %355 = vmatpush3.bf16.msra.mxu1 %v389_v14  ;;  %v385_v17 = vld [vmem:[%s558_s2 + $0x20] sm:$0xff]  }
   0x6   :  { %356 = vmatprep.subr.bf16.mxu1 %v421_v5 }
   0x7   :  { %v30_v10 = vand.u32 2147483647, %v29_v7  ;;  %v33_v11 = vpack.c.bf16 %v32_v8, %v32_v8 }
   0x8   :  { %337 = vmatpush3.bf16.msra.mxu0 %v382_v9 }
   0x9   :  { %v31_v12 = vpack.c.bf16 %v30_v10, %v30_v10  ;;  %43 = vrot.lane.b32.xlu1 %v33_v11, %s424_s28  ;;  %338 = vmatprep.subr.bf16.mxu0 %v421_v5 }
   0xa   :  { %357 = vmatpush3.bf16.msra.mxu1 %v390_v16 }
   0xb   :  { %40 = vrot.lane.b32.xlu0 %v31_v12, %s425_s7  ;;  %358 = vmatprep.subr.bf16.mxu1 %v421_v5 }
   0xc   :  { %339 = vmatpush3.bf16.msra.mxu0 %v383_v13 }
   0xd   :  { %340 = vmatprep.subr.bf16.mxu0 %v421_v5 }
  0x10   :  { %341 = vmatpush3.bf16.msra.mxu0 %v384_v15 }
  0x11   :  { %342 = vmatprep.subr.bf16.mxu0 %v421_v5 }
  0x12   :  { %11 = vsyncpa [#allocation3], 0  ;;  %v386_v19 = vld [vmem:[%s558_s2 + $0x28] sm:$0xff]   ;;  %359 = vmatpush3.bf16.msra.mxu1 %v391_v18  ;;  %v392_v20 = vld [vmem:[%s560_s4 + $0x18] sm:$0xff]   ;;  %vm45_vm1 = vcmask 261120   ;;  %vm49_vm2 = vcmask 523264  }
  0x13   :  { %360 = vmatprep.subr.bf16.mxu1 %v421_v5  ;;  %v387_v21 = vld [vmem:[%s558_s2 + $0x30] sm:$0xff]   ;;  %v393_v22 = vld [vmem:[%s560_s4 + $0x20] sm:$0xff]   ;;  %v388_v23 = vld [vmem:[%s558_s2 + $0x38] sm:$0xff]   ;;  %vm52_vm3 = vcmask 785408   ;;  %s426_s11 = smov [#allocation2]   ;;  %vm281_vm4 = vcmask 64512  }
  0x14   :  { %343 = vmatpush3.bf16.msra.mxu0 %v385_v17  ;;  %v394_v24 = vld [vmem:[%s560_s4 + $0x28] sm:$0xff]   ;;  %v395_v31 = vld [vmem:[%s560_s4 + $0x30] sm:$0xff]   ;;  %v396_v32 = vld [vmem:[%s560_s4 + $0x38] sm:$0xff]   ;;  %s289_s4 = sshll.u32 %s426_s11, 4  ;;  %s290_s4 = int_to_ptr.vmem [resolvable:$true] %s289_s4 }
  0x15   :  { %344 = vmatprep.subr.bf16.mxu0 %v421_v5  ;;  %v298_v33 = vld [vmem:[%s559_s3] ss:$0 sm:$0xff]  ;;  %s397_s3 = scalar_lea.vmem %s290_s4, 128  ;;  %p402_p1 = scmp.lt.s32.totalorder %s290_s4, %s290_s4 }
  0x16   :  { %361 = vmatpush3.bf16.msra.mxu1 %v392_v20  ;;  %v307_v42 = vld [vmem:[%s561_s5] ss:$0 sm:$0xff]  ;;  %p398_p0 = scmp.ne.s32.totalorder %s290_s4, %s397_s3  ;;  %p403_p2 = scmp.lt.s32.totalorder %s397_s3, %s397_s3 }
  0x17   :  { %362 = vmatprep.subr.bf16.mxu1 %v421_v5 }
  0x18   :  { %345 = vmatpush3.bf16.msra.mxu0 %v386_v19  ;;  %p404_p3 = por %p403_p2, %p402_p1 }
  0x19   :  { %346 = vmatprep.subr.bf16.mxu0 %v421_v5 }
  0x1a   :  { %363 = vmatpush3.bf16.msra.mxu1 %v393_v22  ;;  %p405_p4 = pnand %p404_p3, %p398_p0 }
  0x1b   :  { %364 = vmatprep.subr.bf16.mxu1 %v421_v5 }
  0x1c   :  { %347 = vmatpush3.bf16.msra.mxu0 %v387_v21 }
  0x1d   :  { %348 = vmatprep.subr.bf16.mxu0 %v421_v5 }
  0x1e   :  { %365 = vmatpush3.bf16.msra.mxu1 %v394_v24 }
  0x1f   :  { %366 = vmatprep.subr.bf16.mxu1 %v421_v5 }
  0x20   :  { %349 = vmatpush3.bf16.msra.mxu0 %v388_v23 }
  0x22   :  { %367 = vmatpush3.bf16.msra.mxu1 %v395_v31 }
  0x23   :  { %368 = vmatprep.subr.bf16.mxu1 %v421_v5 }
  0x26   :  { %369 = vmatpush3.bf16.msra.mxu1 %v396_v32 }
  0x76   :  { %v38_v25 = vpop.permute.xlu0 %37 }
  0x77   :  { %v48_v27 = vsel %vm45_vm1, %v468_v1, %v38_v25 }
  0x7b   :  { %v44_v26 = vpop.permute.xlu1 %43 }
  0x7d   :  { %v41_v28 = vpop.permute.xlu0 %40 }
  0x7e   :  { %v51_v29 = vsel %vm49_vm2, %v48_v27, %v41_v28 }
  0x7f   :  { %v54_v30 = vsel %vm52_vm3, %v51_v29, %v44_v26 }
  0x80   :  { %351 = vmatmul.mubr.bf16.vlgmr.msra.gmra.mrb[0].mxu0 %v54_v30 }
 0x153   :  { %v161_v34 = vpop.f32.mrb[0].mxu0 }
 0x154   :  { %v162_v35 = vadd.f32 %v298_v33, %v161_v34  ;;  %v352_v36 = vpop.f32.mrb[1].mxu0 }
 0x155   :  { %v164_v37 = vpop.f32.mrb[2].mxu0 }
 0x156   :  { %v167_v38 = vmul.f32 0.01, %v162_v35  ;;  %v353_v39 = vpop.f32.mrb[3].mxu0 }
 0x158   :  { %v168_v40 = vmax.f32 %v162_v35, %v167_v38 }
 0x15a   :  { %v169_v41 = vpack.c.bf16 %v168_v40, %v168_v40 }
 0x15c   :  { %371 = vmatmul.mubr.bf16.vlgmr.msra.gmra.mrb[0].mxu1 %v169_v41 }
 0x22f   :  { %v275_v43 = vpop.f32.mrb[0].mxu1 }
 0x230   :  { %v276_v44 = vadd.f32 %v307_v42, %v275_v43  ;;  %v372_v45 = vpop.f32.mrb[1].mxu1 }
 0x231   :  { %v278_v46 = vpop.f32.mrb[2].mxu1 }
 0x232   :  { %v373_v47 = vpop.f32.mrb[3].mxu1  ;;  %282 = vst.msk [vmem:[#allocation2] sm:$0xff] %vm281_vm4, %v276_v44 }
 0x233   :  { %408 = shalt.err (!%p405_p4)
}
 0x234   :  { %s409_s5 = scalar_lea.hbm %s562_s6, 128 }
 0x235   :  { %p410_p5 = scmp.ne.s32.totalorder %s562_s6, %s409_s5  ;;  %p413_p6 = scmp.lt.u32.totalorder %s409_s5, %s562_s6 }
 0x237   :  { %p415_p7 = pnand %p413_p6, %p410_p5 }
 0x239   :  { %418 = shalt.err (!%p415_p7)
}
 0x23a   :  { %292 = dma.vmem_to_hbm [thread:$0]  %s290_s4, 128, %s562_s6, [#allocation3]  }
 0x23b   :  { %419 = dma.done.wait [#allocation3], 128  }
 0x23c   :  { %420 = vsyncadd [#allocation3], 4294967168 }
 0x23d   :  { %296 = vsyncpa [#allocation3], 1 }

</bundles_post_ra>
